<compile_context>
chip_gen: v5e
topology: v5e:2x2
jax: 0.10.0
libtpu: 0.0.40
codegen_flags: <defaults>
</compile_context>

<pallas_src>
import jax
import jax.numpy as jnp
from jax.experimental import pallas as pl
from jax.experimental.pallas import tpu as pltpu

# ---- synthetic "config" (deterministic, in-script) ----
EMBEDDING_SIZE = 32
LSTM_HIDDEN_UNITS = 64
NUM_LSTM_LAYERS = 2

# Row tile used only when the batch is large enough to benefit from a grid.
_ROW_TILE = 512


def init_net_kernel(x_ref, w_ref, b_ref, y_ref):
    # x_ref: [tm, E]   w_ref: [E, 2H]   b_ref: [1, 2H]   y_ref: [tm, 2H]
    y = jnp.dot(x_ref[...], w_ref[...], preferred_element_type=jnp.float32)
    y_ref[...] = jnp.tanh(y + b_ref[...]).astype(y_ref.dtype)


def prepare_init_net_params(weight, bias):
    """One-time layout plumbing (call at parameter-load time, NOT per forward).

    weight: [2H, E] (PyTorch nn.Linear layout), bias: [2H]
    Returns (w_t [E, 2H], b2d [1, 2H]).
    """
    two_h = weight.shape[0]
    return weight.T, bias.reshape(1, two_h)


def init_net_forward(spectrum_representation, w_t, b2d,
                     num_lstm_layers=NUM_LSTM_LAYERS):
    """spectrum_representation: [N, E] float32
       w_t: [E, 2H] (pre-transposed), b2d: [1, 2H]
    Returns (h_0, c_0), each [num_lstm_layers, N, H]."""
    N, E = spectrum_representation.shape
    two_h = w_t.shape[1]
    H = two_h // 2

    use_grid = (N > _ROW_TILE) and (N % _ROW_TILE == 0)

    if use_grid:
        # Large batch: split rows across a parallel grid (feeds both v7x TCs,
        # keeps per-block VMEM tiny, and lets BlockSpec double-buffer the DMA).
        tm = _ROW_TILE
        y = pl.pallas_call(
            init_net_kernel,
            out_shape=jax.ShapeDtypeStruct((N, two_h), jnp.float32),
            grid=(N // tm,),
            in_specs=[
                pl.BlockSpec((tm, E), lambda i: (i, 0)),
                pl.BlockSpec((E, two_h), lambda i: (0, 0)),
                pl.BlockSpec((1, two_h), lambda i: (0, 0)),
            ],
            out_specs=pl.BlockSpec((tm, two_h), lambda i: (i, 0)),
            compiler_params=pltpu.CompilerParams(
                dimension_semantics=("parallel",)),
        )(spectrum_representation, w_t, b2d)
    else:
        # Small batch: single block, no grid (avoids per-step overhead).
        y = pl.pallas_call(
            init_net_kernel,
            out_shape=jax.ShapeDtypeStruct((N, two_h), jnp.float32),
            in_specs=[
                pl.BlockSpec((N, E), lambda: (0, 0)),
                pl.BlockSpec((E, two_h), lambda: (0, 0)),
                pl.BlockSpec((1, two_h), lambda: (0, 0)),
            ],
            out_specs=pl.BlockSpec((N, two_h), lambda: (0, 0)),
        )(spectrum_representation, w_t, b2d)

    # Zero-cost contiguous slices + broadcast views (torch .repeat materializes
    # copies; values are identical, downstream LSTM consumes them the same).
    h = y[:, :H]
    c = y[:, H:]
    h_0 = jnp.broadcast_to(h[None, :, :], (num_lstm_layers, N, H))
    c_0 = jnp.broadcast_to(c[None, :, :], (num_lstm_layers, N, H))
    return h_0, c_0


# TODO(synk): at production sizes this projection+tanh should be fused into the
# first LSTM-step kernel (h_0/c_0 are its inputs) to drop one launch + HBM trip.


if __name__ == "__main__":
    key = jax.random.PRNGKey(0)
    k_x, k_w, k_b = jax.random.split(key, 3)

    N = 8  # batch
    x = jax.random.normal(k_x, (N, EMBEDDING_SIZE), dtype=jnp.float32)

    # Deterministic parameter init (mimics nn.Linear shapes: [out, in], [out])
    bound = 1.0 / (EMBEDDING_SIZE ** 0.5)
    weight = jax.random.uniform(
        k_w, (2 * LSTM_HIDDEN_UNITS, EMBEDDING_SIZE),
        minval=-bound, maxval=bound, dtype=jnp.float32)
    bias = jax.random.uniform(
        k_b, (2 * LSTM_HIDDEN_UNITS,),
        minval=-bound, maxval=bound, dtype=jnp.float32)

    # One-time layout plumbing outside the per-call path.
    w_t, b2d = prepare_init_net_params(weight, bias)

    fwd = jax.jit(init_net_forward, static_argnums=(3,))
    h_0, c_0 = fwd(x, w_t, b2d, NUM_LSTM_LAYERS)
    jax.block_until_ready((h_0, c_0))

    # Reference check in plain JAX (same math as torch forward)
    y_ref = jnp.tanh(x @ weight.T + bias)
    h_ref = jnp.tile(y_ref[:, :LSTM_HIDDEN_UNITS][None], (NUM_LSTM_LAYERS, 1, 1))
    c_ref = jnp.tile(y_ref[:, LSTM_HIDDEN_UNITS:][None], (NUM_LSTM_LAYERS, 1, 1))
    assert h_0.shape == (NUM_LSTM_LAYERS, N, LSTM_HIDDEN_UNITS)
    assert c_0.shape == (NUM_LSTM_LAYERS, N, LSTM_HIDDEN_UNITS)
    assert jnp.allclose(h_0, h_ref, atol=1e-5, rtol=1e-5)
    assert jnp.allclose(c_0, c_ref, atol=1e-5, rtol=1e-5)

    print("KERNEL_OK")
</pallas_src>

<mosaic_0001>
module attributes {stable_mosaic.version = 11 : i64} {
  func.func @init_net_kernel(%arg0: memref<8x32xf32, #tpu.memory_space<vmem>>, %arg1: memref<32x128xf32, #tpu.memory_space<vmem>>, %arg2: memref<1x128xf32, #tpu.memory_space<vmem>>, %arg3: memref<8x128xf32, #tpu.memory_space<vmem>>) attributes {dimension_semantics = [], scalar_prefetch = 0 : i64, scratch_operands = 0 : i64, tpu.core_type = #tpu.core_type<tc>} {
    %c0 = arith.constant 0 : index
    %c0_0 = arith.constant 0 : index
    %0 = vector.load %arg0[%c0, %c0_0] : memref<8x32xf32, #tpu.memory_space<vmem>>, vector<8x32xf32>
    %c0_1 = arith.constant 0 : index
    %c0_2 = arith.constant 0 : index
    %1 = vector.load %arg1[%c0_1, %c0_2] : memref<32x128xf32, #tpu.memory_space<vmem>>, vector<32x128xf32>
    %cst = arith.constant dense<0.000000e+00> : vector<8x128xf32>
    %2 = tpu.matmul %0, %1, %cst {dimension_numbers = #tpu.dot_dimension_numbers<[1], [0], [0], [1], [0, 0, 1, 1], [], []>} : vector<8x32xf32>, vector<32x128xf32>, vector<8x128xf32> -> vector<8x128xf32>
    %c0_3 = arith.constant 0 : index
    %c0_4 = arith.constant 0 : index
    %3 = vector.load %arg2[%c0_3, %c0_4] : memref<1x128xf32, #tpu.memory_space<vmem>>, vector<1x128xf32>
    %4 = vector.broadcast %3 : vector<1x128xf32> to vector<8x128xf32>
    %5 = arith.addf %2, %4 : vector<8x128xf32>
    %6 = math.tanh %5 : vector<8x128xf32>
    %c0_5 = arith.constant 0 : index
    %c0_6 = arith.constant 0 : index
    %7 = vector.load %arg3[%c0_5, %c0_6] : memref<8x128xf32, #tpu.memory_space<vmem>>, vector<8x128xf32>
    tpu.vector_store %arg3[%c0_5, %c0_6], %6 {strides = array<i32>} : memref<8x128xf32, #tpu.memory_space<vmem>>, vector<8x128xf32>,
    return
  }
}

</mosaic_0001>

<bundles_post_ra>
// kernel: init_net_forward.1
= control target key start
LH: loop header
LB: loop body
LE: loop exit
PB: predicated region body
PF: predicated region fallthrough
CT: control target
= control target key end

     0   :  { %8 = vsyncpa [#allocation3], 0  ;;  %s181_s0 = inlined_call_operand.hbm [shape: f32[8,32], index: 0, kind: input, shape index: {}]   ;;  %s182_s1 = inlined_call_operand.hbm [shape: f32[32,128], index: 1, kind: input, shape index: {}]   ;;  %s183_s2 = inlined_call_operand.vmem [shape: f32[1,128], index: 2, kind: input, shape index: {}]   ;;  %s184_s3 = inlined_call_operand.vmem [shape: f32[8,128], index: 3, kind: output, shape index: {}]  }
   0x1   :  { %s15_s14 = sshll.u32 %s181_s0, 4  ;;  %s16_s14 = int_to_ptr.hbm [resolvable:$true] %s15_s14 }
   0x2   :  { %9 = vsyncpa [#allocation5], 0  ;;  %s145_s15 = smov [#allocation2]   ;;  %s25_s19 = sshll.u32 %s182_s1, 4  ;;  %s26_s19 = int_to_ptr.hbm [resolvable:$true] %s25_s19 }
   0x3   :  { %s17_s16 = sshll.u32 %s145_s15, 4  ;;  %s146_s20 = smov [#allocation4]   ;;  %s18_s16 = int_to_ptr.vmem [resolvable:$true] %s17_s16 }
   0x4   :  { %20 = dma.hbm_to_vmem [thread:$0]  %s16_s14, 128, %s18_s16, [#allocation3]  }
   0x5   :  { %s27_s21 = sshll.u32 %s146_s20, 4  ;;  %s147_s22 = smov 128   ;;  %s28_s21 = int_to_ptr.vmem [resolvable:$true] %s27_s21 }
   0x6   :  { %s148_s23 = smov 8  }
   0x7   :  { %33 = dma.hbm_to_vmem [thread:$0]  %s26_s19, 512, %s28_s21, [#allocation5], %s147_s22, %s147_s22, %s148_s23  }
   0x8   :  { %141 = dma.done.wait [#allocation3], 128  }
   0x9   :  { %142 = vsyncadd [#allocation3], 4294967168 }
   0xa   :  { %143 = dma.done.wait [#allocation5], 512  }
   0xb   :  { %144 = vsyncadd [#allocation5], 4294966784  ;;  %v48_v0 = vld [vmem:[#allocation4 + $0x18] sm:$0xff]  ;;  %v47_v1 = vld [vmem:[#allocation4 + $0x10] sm:$0xff]  ;;  %vm53_vm0 = vcmask 261120  }
   0xc   :  { %69 = vmatpush.msra.mxu0 %v48_v0  ;;  %v46_v2 = vld [vmem:[#allocation4 + $0x8] sm:$0xff]  ;;  %v45_v3 = vld [vmem:[#allocation4] sm:$0xff]  ;;  %v44_v4 = vld [vmem:[#allocation2] sm:$0xff] }
   0xd   :  { %v90_v5 = vld [vmem:[%s183_s2] ss:$0 sm:$0xff] }
   0xe   :  { %70 = vmatpush.msra.mxu0 %v47_v1 }
  0x10   :  { %71 = vmatpush.msra.mxu0 %v46_v2 }
  0x12   :  { %72 = vmatpush.msra.mxu0 %v45_v3 }
  0x13   :  { %85 = vmatmul.msk.f32.vlgmr.msra.gmra.mxu0 %vm53_vm0, %v44_v4 }
  0x90   :  { %v74_v6 = vpop.f32.mrf.mxu0 }
  0x91   :  { %v75_v7 = vadd.f32 %v90_v5, %v74_v6 }
  0x93   :  { %91 = vtanh.f32 %v75_v7 }
  0x99   :  { %v92_v8 = vpop.eup %91 }
  0x9a   :  { %78 = vst [vmem:[%s184_s3] sm:$0xff] %v92_v8 }
  0x9b   :  { %83 = vsyncpa [#allocation3], 1 }
  0x9c   :  { %84 = vsyncpa [#allocation5], 1 }

</bundles_post_ra>
